<compile_context>
chip_gen: v5e
topology: v5e:2x2
jax: 0.10.0
libtpu: 0.0.40
codegen_flags: <defaults>
</compile_context>

<pallas_src>
import jax
import jax.numpy as jnp
from jax import lax
from jax.experimental import pallas as pl
from jax.experimental.pallas import tpu as pltpu


def _round_up(a, b):
    return (a + b - 1) // b * b


def _grid_sample_kernel(grid_ref, tex_t_ref, out_ref):
    # grid_ref : (2, TP) f32   -- row 0 = x coord, row 1 = y coord (module's input, pre *2-1)
    # tex_t_ref: (W_in, H_in) f32  -- texture transposed so the matmul emits (W_in, TP)
    # out_ref  : (1, TP) f32   -- lane-dense output
    W_in, H_in = tex_t_ref.shape

    # Folded align_corners=True un-normalization: ((x*2-1)+1)*0.5*(size-1) == x*(size-1)
    fx = grid_ref[0:1, :] * jnp.float32(W_in - 1)      # (1, TP)
    fy = grid_ref[1:2, :] * jnp.float32(H_in - 1)      # (1, TP)

    # Bilinear "hat" weights: relu(1 - |row - f|).  At row=floor(f) this is 1-frac, at
    # row=floor(f)+1 it is frac, and 0 elsewhere -- i.e. exactly align_corners=True
    # bilinear with zeros padding (out-of-range corners contribute nothing).
    row_h = lax.broadcasted_iota(jnp.int32, (H_in, 1), 0).astype(jnp.float32)  # (H_in, 1)
    row_w = lax.broadcasted_iota(jnp.int32, (W_in, 1), 0).astype(jnp.float32)  # (W_in, 1)
    Ry = jnp.maximum(1.0 - jnp.abs(row_h - fy), 0.0)   # (H_in, TP)
    Cx = jnp.maximum(1.0 - jnp.abs(row_w - fx), 0.0)   # (W_in, TP)

    rt = jnp.dot(tex_t_ref[...], Ry, preferred_element_type=jnp.float32)  # (W_in, TP)
    out_ref[...] = jnp.sum(Cx * rt, axis=0, keepdims=True)                # (1, TP)


def single_layer_texture_forward(x, texture, *, tile_p=8192):
    """x: (B, H_out, W_out, 2) f32; texture: (1, 1, W, H) f32 (PyTorch NCHW param).

    Returns y: (B, 1, H_out, W_out) f32 matching
    F.grid_sample(texture.repeat(B,1,1,1), x*2-1, mode='bilinear',
                  padding_mode='zeros', align_corners=True).
    """
    B, Ho, Wo, _ = x.shape
    # PyTorch NCHW: sampled-image height = param.shape[2], width = param.shape[3].
    H_in, W_in = texture.shape[2], texture.shape[3]
    P = B * Ho * Wo

    # Lane-aligned point tile.  Large cap amortizes the ~0.35us per-grid-step overhead;
    # the cdiv(P,2) term keeps >=2 grid steps for medium P so both v7x TensorCores engage.
    TP = min(tile_p, _round_up(pl.cdiv(P, 2), 128))
    P_pad = _round_up(P, TP)

    grid_flat = x.reshape(P, 2).astype(jnp.float32)
    if P_pad != P:
        grid_flat = jnp.pad(grid_flat, ((0, P_pad - P), (0, 0)))
    grid_t = grid_flat.T                                        # (2, P_pad), P on lanes

    tex_t = texture.reshape(H_in, W_in).astype(jnp.float32).T   # (W_in, H_in)

    cost = pl.CostEstimate(
        flops=int(P_pad) * (2 * H_in * W_in + 6 * (H_in + W_in) + 8),
        transcendentals=0,
        bytes_accessed=int(P_pad) * 12 + H_in * W_in * 4,
    )

    y = pl.pallas_call(
        _grid_sample_kernel,
        out_shape=jax.ShapeDtypeStruct((1, P_pad), jnp.float32),
        grid=(P_pad // TP,),
        in_specs=[
            pl.BlockSpec((2, TP), lambda i: (0, i)),            # point tile, double-buffered
            pl.BlockSpec((W_in, H_in), lambda i: (0, 0)),       # texture resident across loop
        ],
        out_specs=pl.BlockSpec((1, TP), lambda i: (0, i)),      # lane-dense output tile
        compiler_params=pltpu.CompilerParams(
            dimension_semantics=("parallel",),                  # megacore split on v7x
            vmem_limit_bytes=32 * 1024 * 1024),
        cost_estimate=cost,
    )(grid_t, tex_t)

    return y[0, :P].reshape(B, Ho, Wo)[:, None, :, :]


def _ref_forward(x, texture):
    """Pure-JAX reference (same grid_sample semantics, unfolded normalization)."""
    H_in, W_in = texture.shape[2], texture.shape[3]
    tex = texture.reshape(H_in, W_in)
    g = x * 2.0 - 1.0
    fx = (g[..., 0] + 1.0) * 0.5 * (W_in - 1)
    fy = (g[..., 1] + 1.0) * 0.5 * (H_in - 1)
    ix0 = jnp.floor(fx).astype(jnp.int32)
    iy0 = jnp.floor(fy).astype(jnp.int32)
    ix1, iy1 = ix0 + 1, iy0 + 1
    wx1 = fx - ix0
    wx0 = 1.0 - wx1
    wy1 = fy - iy0
    wy0 = 1.0 - wy1

    def gather(iy, ix):
        valid = (iy >= 0) & (iy < H_in) & (ix >= 0) & (ix < W_in)
        iyc = jnp.clip(iy, 0, H_in - 1)
        ixc = jnp.clip(ix, 0, W_in - 1)
        return jnp.where(valid, tex[iyc, ixc], 0.0)

    out = (wy0 * wx0 * gather(iy0, ix0) + wy0 * wx1 * gather(iy0, ix1)
           + wy1 * wx0 * gather(iy1, ix0) + wy1 * wx1 * gather(iy1, ix1))
    return out[:, None, :, :]


if __name__ == "__main__":
    key = jax.random.PRNGKey(0)
    k_tex, k_x1, k_x2, k_x3 = jax.random.split(key, 4)

    W, H = 16, 16  # texture size (module __init__ args)

    # Module __init__ uses zeros; use a deterministic random texture so the
    # output is non-trivial (zeros would make the kernel output all-zero).
    texture = jax.random.normal(k_tex, (1, 1, W, H), dtype=jnp.float32)

    # Case 1: small shape (single tile).
    B, Ho, Wo = 2, 8, 8
    x1 = jax.random.uniform(k_x1, (B, Ho, Wo, 2), dtype=jnp.float32)
    y1 = jax.block_until_ready(single_layer_texture_forward(x1, texture))
    y1_ref = _ref_forward(x1, texture)
    assert y1.shape == (B, 1, Ho, Wo)
    assert jnp.allclose(y1, y1_ref, atol=1e-5, rtol=1e-5)

    # Case 2: medium grid (exercises the >=2-step megacore split + zero padding outside [0,1]).
    B2, Ho2, Wo2 = 2, 48, 48
    x2 = jax.random.uniform(k_x2, (B2, Ho2, Wo2, 2), dtype=jnp.float32,
                            minval=-0.05, maxval=1.05)
    y2 = jax.block_until_ready(single_layer_texture_forward(x2, texture))
    y2_ref = _ref_forward(x2, texture)
    assert y2.shape == (B2, 1, Ho2, Wo2)
    assert jnp.allclose(y2, y2_ref, atol=1e-5, rtol=1e-5)

    # Case 3: larger grid (exercises the 8192-point tile cap + padded tail points).
    B3, Ho3, Wo3 = 2, 96, 96
    x3 = jax.random.uniform(k_x3, (B3, Ho3, Wo3, 2), dtype=jnp.float32,
                            minval=-0.05, maxval=1.05)
    y3 = jax.block_until_ready(single_layer_texture_forward(x3, texture))
    y3_ref = _ref_forward(x3, texture)
    assert y3.shape == (B3, 1, Ho3, Wo3)
    assert jnp.allclose(y3, y3_ref, atol=1e-5, rtol=1e-5)

    print("KERNEL_OK")
</pallas_src>

<mosaic_0001>
module attributes {stable_mosaic.version = 11 : i64} {
  func.func @_grid_sample_kernel(%arg0: i32, %arg1: memref<2x128xf32, #tpu.memory_space<vmem>>, %arg2: memref<16x16xf32, #tpu.memory_space<vmem>>, %arg3: memref<1x128xf32, #tpu.memory_space<vmem>>) attributes {dimension_semantics = [#tpu.dimension_semantics<parallel>], iteration_bounds = array<i64: 1>, scalar_prefetch = 0 : i64, scratch_operands = 0 : i64, tpu.core_type = #tpu.core_type<tc>, window_params = [{transform_indices = @transform_0, window_bounds = array<i64: 2, 128>}, {pipeline_mode = #tpu.pipeline_mode<synchronous>, transform_indices = @transform_1, window_bounds = array<i64: 16, 16>}, {transform_indices = @transform_2, window_bounds = array<i64: 1, 128>}]} {
    %c0 = arith.constant 0 : index
    %c0_0 = arith.constant 0 : index
    %0 = vector.load %arg1[%c0, %c0_0] : memref<2x128xf32, #tpu.memory_space<vmem>>, vector<1x128xf32>
    %cst = arith.constant 1.500000e+01 : f32
    %1 = vector.broadcast %cst : f32 to vector<1x128xf32>
    %2 = arith.mulf %0, %1 : vector<1x128xf32>
    %c1 = arith.constant 1 : index
    %c0_1 = arith.constant 0 : index
    %3 = vector.load %arg1[%c1, %c0_1] : memref<2x128xf32, #tpu.memory_space<vmem>>, vector<1x128xf32>
    %cst_2 = arith.constant 1.500000e+01 : f32
    %4 = vector.broadcast %cst_2 : f32 to vector<1x128xf32>
    %5 = arith.mulf %3, %4 : vector<1x128xf32>
    %6 = tpu.iota {dimensions = array<i32: 0>} : vector<16x1xi32>
    %7 = arith.sitofp %6 : vector<16x1xi32> to vector<16x1xf32>
    %8 = tpu.iota {dimensions = array<i32: 0>} : vector<16x1xi32>
    %9 = arith.sitofp %8 : vector<16x1xi32> to vector<16x1xf32>
    %10 = vector.broadcast %7 : vector<16x1xf32> to vector<16x128xf32>
    %11 = vector.broadcast %5 : vector<1x128xf32> to vector<16x128xf32>
    %12 = arith.subf %10, %11 : vector<16x128xf32>
    %13 = math.absf %12 : vector<16x128xf32>
    %cst_3 = arith.constant 1.000000e+00 : f32
    %14 = vector.broadcast %cst_3 : f32 to vector<16x128xf32>
    %15 = arith.subf %14, %13 : vector<16x128xf32>
    %cst_4 = arith.constant 0.000000e+00 : f32
    %16 = vector.broadcast %cst_4 : f32 to vector<16x128xf32>
    %17 = arith.maximumf %15, %16 : vector<16x128xf32>
    %18 = vector.broadcast %9 : vector<16x1xf32> to vector<16x128xf32>
    %19 = vector.broadcast %2 : vector<1x128xf32> to vector<16x128xf32>
    %20 = arith.subf %18, %19 : vector<16x128xf32>
    %21 = math.absf %20 : vector<16x128xf32>
    %cst_5 = arith.constant 1.000000e+00 : f32
    %22 = vector.broadcast %cst_5 : f32 to vector<16x128xf32>
    %23 = arith.subf %22, %21 : vector<16x128xf32>
    %cst_6 = arith.constant 0.000000e+00 : f32
    %24 = vector.broadcast %cst_6 : f32 to vector<16x128xf32>
    %25 = arith.maximumf %23, %24 : vector<16x128xf32>
    %c0_7 = arith.constant 0 : index
    %c0_8 = arith.constant 0 : index
    %26 = vector.load %arg2[%c0_7, %c0_8] : memref<16x16xf32, #tpu.memory_space<vmem>>, vector<16x16xf32>
    %cst_9 = arith.constant dense<0.000000e+00> : vector<16x128xf32>
    %27 = tpu.matmul %26, %17, %cst_9 {dimension_numbers = #tpu.dot_dimension_numbers<[1], [0], [0], [1], [0, 0, 1, 1], [], []>} : vector<16x16xf32>, vector<16x128xf32>, vector<16x128xf32> -> vector<16x128xf32>
    %28 = arith.mulf %25, %27 : vector<16x128xf32>
    %cst_10 = arith.constant dense<0.000000e+00> : vector<128xf32>
    %29 = vector.multi_reduction <add>, %28, %cst_10 [0] : vector<16x128xf32> to vector<128xf32>
    %30 = vector.shape_cast %29 : vector<128xf32> to vector<1x128xf32>
    %c0_11 = arith.constant 0 : index
    %c0_12 = arith.constant 0 : index
    %31 = vector.load %arg3[%c0_11, %c0_12] : memref<1x128xf32, #tpu.memory_space<vmem>>, vector<1x128xf32>
    tpu.vector_store %arg3[%c0_11, %c0_12], %30 {strides = array<i32>} : memref<1x128xf32, #tpu.memory_space<vmem>>, vector<1x128xf32>,
    return
  }
  func.func @transform_0(%arg0: i32) -> (i32, i32) {
    %c0_i32 = arith.constant 0 : i32
    %c0_i32_0 = arith.constant 0 : i32
    return %c0_i32, %arg0 : i32, i32
  }
  func.func @transform_1(%arg0: i32) -> (i32, i32) {
    %c0_i32 = arith.constant 0 : i32
    %c0_i32_0 = arith.constant 0 : i32
    %c0_i32_1 = arith.constant 0 : i32
    return %c0_i32, %c0_i32_0 : i32, i32
  }
  func.func @transform_2(%arg0: i32) -> (i32, i32) {
    %c0_i32 = arith.constant 0 : i32
    %c0_i32_0 = arith.constant 0 : i32
    return %c0_i32, %arg0 : i32, i32
  }
}

</mosaic_0001>

<bundles_post_ra>
// kernel: tpu_custom_call.1
= control target key start
LH: loop header
LB: loop body
LE: loop exit
PB: predicated region body
PF: predicated region fallthrough
CT: control target
= control target key end

     0   :  { %7 = vsyncpa [#allocation3], 0  ;;  %s245_s0 = inlined_call_operand.hbm [shape: f32[2,128], index: 0, kind: input, shape index: {}]   ;;  %s246_s1 = inlined_call_operand.hbm [shape: f32[16,16], index: 1, kind: input, shape index: {}]   ;;  %s247_s2 = inlined_call_operand.hbm [shape: f32[1,128], index: 2, kind: output, shape index: {}]  }
   0x1   :  { %8 = vsyncpa [#allocation6], 0 }
   0x2   :  { %9 = vsyncpa [#allocation4], 0  ;;  %s15_s11 = sshll.u32 %s245_s0, 4  ;;  %s216_s12 = smov [#allocation2]   ;;  %s16_s11 = int_to_ptr.hbm [resolvable:$true] %s15_s11 }
   0x3   :  { %s17_s13 = sshll.u32 %s216_s12, 4  ;;  %s25_s16 = sshll.u32 %s246_s1, 4  ;;  %s18_s13 = int_to_ptr.vmem [resolvable:$true] %s17_s13  ;;  %s26_s16 = int_to_ptr.hbm [resolvable:$true] %s25_s16 }
   0x4   :  { %20 = dma.hbm_to_vmem [thread:$0]  %s16_s11, 32, %s18_s13, [#allocation3]  }
   0x5   :  { %s217_s17 = smov [#allocation5]   ;;  %s218_s19 = smov 128  }
   0x6   :  { %s27_s18 = sshll.u32 %s217_s17, 4  ;;  %s219_s20 = smov 8   ;;  %s28_s18 = int_to_ptr.vmem [resolvable:$true] %s27_s18 }
   0x7   :  { %33 = dma.hbm_to_vmem [thread:$0]  %s26_s16, 256, %s28_s18, [#allocation6], %s218_s19, %s218_s19, %s219_s20  }
   0x8   :  { %210 = dma.done.wait [#allocation3], 32  }
   0x9   :  { %211 = vsyncadd [#allocation3], 4294967264 }
   0xa   :  { %212 = dma.done.wait [#allocation6], 256  }
   0xb   :  { %213 = vsyncadd [#allocation6], 4294967040  ;;  %v46_v0 = vlaneseq  ;;  %v44_v3 = vld [vmem:[#allocation2 + $0x1] sm:$0x1]  ;;  %v69_v16 = vld [vmem:[#allocation5] sm:$0xff]  ;;  %vm71_vm0 = vcmask 130048  }
   0xc   :  { %v45_v4 = vmul.f32 15.0, %v44_v3  ;;  %v70_v17 = vld [vmem:[#allocation5 + $0x8] sm:$0xff]  ;;  %v42_v18 = vld [vmem:[#allocation2] sm:$0x1]  ;;  %s220_s0 = smov [#allocation7]   ;;  %s118_s23 = sshll.u32 %s247_s2, 4  ;;  %s119_s23 = int_to_ptr.hbm [resolvable:$true] %s118_s23 }
   0xd   :  { %v47_v1 = vshrl.u32 %v46_v0, 7  ;;  %v43_v19 = vmul.f32 15.0, %v42_v18  ;;  %s116_s1 = sshll.u32 %s220_s0, 4  ;;  %s117_s1 = int_to_ptr.vmem [resolvable:$true] %s116_s1 }
   0xe   :  { %v51_v7 = vperm.slane %v45_v4, 0 }
   0xf   :  { %v48_v2 = vadd.s32 8, %v47_v1  ;;  %v49_v6 = vcvt.s32.f32 %v47_v1  ;;  %v60_v20 = vperm.slane %v43_v19, 0 }
  0x11   :  { %v50_v5 = vcvt.s32.f32 %v48_v2  ;;  %v52_v9 = vsub.f32 %v49_v6, %v51_v7  ;;  %v61_v21 = vsub.f32 %v49_v6, %v60_v20 }
  0x13   :  { %v53_v8 = vsub.f32 %v50_v5, %v51_v7  ;;  %v54_v11 = vand.u32 2147483647, %v52_v9  ;;  %v62_v22 = vsub.f32 %v50_v5, %v60_v20  ;;  %v63_v23 = vand.u32 2147483647, %v61_v21 }
  0x15   :  { %v55_v10 = vand.u32 2147483647, %v53_v8  ;;  %v56_v13 = vsub.f32 1.0, %v54_v11  ;;  %v64_v24 = vand.u32 2147483647, %v62_v22  ;;  %v65_v25 = vsub.f32 1.0, %v63_v23 }
  0x17   :  { %v57_v12 = vsub.f32 1.0, %v55_v10  ;;  %v58_v15 = vmax.f32 %v56_v13, 0.0  ;;  %v66_v26 = vsub.f32 1.0, %v64_v24  ;;  %v67_v27 = vmax.f32 %v65_v25, 0.0 }
  0x19   :  { %v59_v14 = vmax.f32 %v57_v12, 0.0  ;;  %v68_v28 = vmax.f32 %v66_v26, 0.0 }
  0x1b   :  { %92 = vmatpush.msra.mxu0 %v59_v14  ;;  %131 = vmatpush.msra.mxu1 %v59_v14 }
  0x1d   :  { %93 = vmatpush.msra.mxu0 %v58_v15  ;;  %132 = vmatpush.msra.mxu1 %v58_v15 }
  0x1e   :  { %129 = vmatmul.msk.f32.vlgmr.msra.gmra.mxu0 %vm71_vm0, %v69_v16  ;;  %130 = vmatmul.msk.f32.vlgmr.msra.gmra.mxu1 %vm71_vm0, %v70_v17 }
  0x9b   :  { %v95_v29 = vpop.f32.mrf.mxu0  ;;  %v98_v30 = vpop.f32.mrf.mxu1 }
  0x9c   :  { %v101_v31 = vmul.f32 %v95_v29, %v67_v27  ;;  %v102_v32 = vmul.f32 %v98_v30, %v68_v28 }
  0x9e   :  { %v103_v33 = vadd.f32 %v102_v32, %v101_v31 }
  0xa0   :  { %v104_v34 = vrot.slane %v103_v33, 4 }
  0xa2   :  { %v105_v35 = vadd.f32 %v104_v34, %v103_v33 }
  0xa4   :  { %v106_v36 = vrot.slane %v105_v35, 2 }
  0xa6   :  { %v107_v37 = vadd.f32 %v106_v36, %v105_v35 }
  0xa8   :  { %v108_v38 = vrot.slane %v107_v37, 1 }
  0xaa   :  { %v109_v39 = vadd.f32 %v108_v38, %v107_v37 }
  0xac   :  { %110 = vst [vmem:[#allocation7] sm:$0x1] %v109_v39 }
  0xad   :  { %121 = dma.vmem_to_hbm [thread:$0]  %s117_s1, 16, %s119_s23, [#allocation4]  }
  0xae   :  { %214 = dma.done.wait [#allocation4], 16  }
  0xaf   :  { %215 = vsyncadd [#allocation4], 4294967280 }
  0xb0   :  { %126 = vsyncpa [#allocation3], 1 }
  0xb1   :  { %127 = vsyncpa [#allocation6], 1 }
  0xb2   :  { %128 = vsyncpa [#allocation4], 1 }

</bundles_post_ra>
